<compile_context>
chip_gen: v6e
topology: v6e:2x2x1
jax: 0.10.0
libtpu: 0.0.40
codegen_flags: <defaults>
</compile_context>

<pallas_src>
import functools

import numpy as np
import jax
import jax.numpy as jnp
from jax.experimental import pallas as pl
from jax.experimental.pallas import tpu as pltpu

EPS = 1e-5                        # nn.BatchNorm2d default eps
VMEM_LIMIT = 32 * 1024 * 1024     # ample: Nb blocking caps per-step tiles to ~2 MiB,
                                  # safe on v5e/v6e (128 MiB) and v7x (64 MiB)
TILE_BUDGET_BYTES = 2 * 1024 * 1024   # per-grid-step activation budget (x2 dbl-buffer)


# --------------------------------------------------------------------------- #
# Kernels
# --------------------------------------------------------------------------- #
def conv_stats_kernel(x_ref, scale_ref, shift_ref, w_ref, out_ref, stats_ref,
                      *, H, W, Cin, Cout, pre_norm_relu):
    """[fused prev-layer BN+ReLU] -> reflect-pad 3x3 conv for Nb images.

    x_ref     : (Nb, H, W*Cin)  bf16 lane-dense raw activations
    scale_ref : (1, W*Cin)      f32 previous layer's BN scale (gamma*rstd), W-tiled
    shift_ref : (1, W*Cin)      f32 previous layer's BN shift (beta - mean*scale)
    w_ref     : (3*W*Cin, W*Cout) bf16 column-folded conv weights (see wrapper)
    out_ref   : (Nb, H, W*Cout) bf16 raw conv output (pre-BN/ReLU), lane-dense
    stats_ref : (1, 2, W*Cout)  f32 per-step [sum, sum_sq] over (Nb, H) per (w, c)
    """
    Nb = x_ref.shape[0]
    x = x_ref[...]                                           # (Nb, H, W*Cin) bf16
    if pre_norm_relu:
        # Fused BatchNorm + ReLU of the *previous* layer (saves one HBM pass).
        x = jnp.maximum(x.astype(jnp.float32) * scale_ref[...] + shift_ref[...],
                        0.0).astype(jnp.bfloat16)

    # Reflect row shifts (p=1) as sublane slices/concats, fully lane-dense.
    top = jnp.concatenate([x[:, 1:2], x[:, :H - 1]], axis=1)    # row h-1
    bot = jnp.concatenate([x[:, 1:], x[:, H - 2:H - 1]], axis=1)  # row h+1

    # Lane-concat of the three row planes -> K = 3*W*Cin MXU contraction.
    # Column taps + reflect column padding live inside w_ref's block structure.
    xr = jnp.concatenate([top, x, bot], axis=-1)             # (Nb, H, 3*W*Cin)
    xr = xr.reshape(Nb * H, 3 * W * Cin)

    acc = jax.lax.dot_general(
        xr, w_ref[...],
        dimension_numbers=(((1,), (0,)), ((), ())),
        preferred_element_type=jnp.float32)                  # (Nb*H, W*Cout) f32

    # One-pass BatchNorm statistics for this block (per (w, channel) lane; the
    # tiny fold over W happens in XLA).  No conv-bias add: a per-channel
    # constant is cancelled exactly by train-mode mean subtraction.
    s = jnp.sum(acc, axis=0, keepdims=True)                  # (1, W*Cout)
    ss = jnp.sum(acc * acc, axis=0, keepdims=True)           # (1, W*Cout)
    stats_ref[0] = jnp.concatenate([s, ss], axis=0)          # (2, W*Cout)

    # Lane-dense store straight from the matmul output (no W/Cout interleave).
    out_ref[...] = acc.reshape(Nb, H, W * Cout).astype(out_ref.dtype)


def bn_relu_kernel(x_ref, scale_ref, shift_ref, o_ref, *, apply_relu):
    """Final-layer BatchNorm (+ optional ReLU), lane-dense elementwise."""
    y = x_ref[...].astype(jnp.float32) * scale_ref[...] + shift_ref[...]
    if apply_relu:
        y = jnp.maximum(y, 0.0)
    o_ref[...] = y.astype(o_ref.dtype)


# --------------------------------------------------------------------------- #
# Wrapper helpers
# --------------------------------------------------------------------------- #
def _align_channels(c, W):
    """Smallest c' >= c with (W*c') % 128 == 0, when W divides 128."""
    if 128 % W == 0:
        m = 128 // W
        return ((c + m - 1) // m) * m
    return c


def _pick_nb(n, per_image_bytes, budget_bytes=TILE_BUDGET_BYTES):
    """Largest divisor of n that keeps tiles under budget and the grid >= 2."""
    cap = max(1, budget_bytes // max(per_image_bytes, 1))
    best = 1
    for d in range(1, min(n, 256) + 1):
        if n % d != 0 or d > cap:
            continue
        if n >= 2 and n // d < 2:     # keep >=2 grid steps for v7x megacore
            continue
        best = d
    return best


def _fold_conv_weight(wk, W):
    """(3, 3, Cin, Cout) conv weight -> (3*W*Cin, W*Cout) column-folded matrix.

    Row taps (dy) stay explicit (the kernel lane-concats three reflect
    row-shifted planes); column taps (dx) and reflect column padding are folded
    into the weight's block-diagonal structure so the conv is a single
    lane-dense contraction producing (.., W*Cout) directly.
    """
    cin, cout = wk.shape[2], wk.shape[3]
    sel = np.zeros((3, W, W), np.float32)          # sel[dx, w, j_source]
    for dx in range(3):
        for w in range(W):
            j = w + dx - 1
            j = -j if j < 0 else (2 * W - 2 - j if j >= W else j)   # reflect, p=1
            sel[dx, w, j] = 1.0
    bw = jnp.einsum('dwj,ydio->yjiwo', jnp.asarray(sel), wk.astype(jnp.float32))
    return bw.reshape(3 * W * cin, W * cout)


def _bn_scale_shift(stats, gamma, beta, count, W):
    """Per-step [sum, sumsq] over (w, c) lanes -> train-mode BN (scale, shift)."""
    cout = gamma.shape[0]
    tot = jnp.sum(stats.astype(jnp.float32), axis=0)      # (2, W*cout)
    tot = tot.reshape(2, W, cout).sum(axis=1)              # (2, cout)
    mean = tot[0] / count
    var = jnp.maximum(tot[1] / count - mean * mean, 0.0)   # biased batch var
    rstd = jax.lax.rsqrt(var + EPS)
    scale = gamma * rstd
    shift = beta - mean * scale
    return scale, shift


# --------------------------------------------------------------------------- #
# Staged pallas_call wrappers
# --------------------------------------------------------------------------- #
def _conv_stage(x_dense, scale_t, shift_t, w_fold, *, H, W, Cin, Cout,
                pre_norm_relu):
    """Gridded conv stage: returns (raw bf16 conv output, per-step BN stats)."""
    N = x_dense.shape[0]
    per_img = H * W * (Cin + Cout) * 2                      # bf16 in + out
    Nb = _pick_nb(N, per_img)
    G = N // Nb
    kernel = functools.partial(conv_stats_kernel, H=H, W=W, Cin=Cin, Cout=Cout,
                               pre_norm_relu=pre_norm_relu)
    flops = 2 * N * H * (3 * W * Cin) * (W * Cout)
    bytes_accessed = (N * H * W * Cin * 2 + N * H * W * Cout * 2
                      + 3 * W * Cin * W * Cout * 2 + 2 * W * Cin * 4
                      + G * 2 * W * Cout * 4)
    return pl.pallas_call(
        kernel,
        grid=(G,),
        in_specs=[
            pl.BlockSpec((Nb, H, W * Cin), lambda n: (n, 0, 0)),
            pl.BlockSpec((1, W * Cin), lambda n: (0, 0)),
            pl.BlockSpec((1, W * Cin), lambda n: (0, 0)),
            pl.BlockSpec((3 * W * Cin, W * Cout), lambda n: (0, 0)),
        ],
        out_specs=(
            pl.BlockSpec((Nb, H, W * Cout), lambda n: (n, 0, 0)),
            pl.BlockSpec((1, 2, W * Cout), lambda n: (n, 0, 0)),
        ),
        out_shape=(
            jax.ShapeDtypeStruct((N, H, W * Cout), jnp.bfloat16),
            jax.ShapeDtypeStruct((G, 2, W * Cout), jnp.float32),
        ),
        compiler_params=pltpu.CompilerParams(
            dimension_semantics=("parallel",),
            vmem_limit_bytes=VMEM_LIMIT),
        cost_estimate=pl.CostEstimate(flops=flops, transcendentals=0,
                                      bytes_accessed=bytes_accessed),
    )(x_dense, scale_t, shift_t, w_fold)


def _bn_relu_stage(x_dense, scale_t, shift_t, *, H, W, C, apply_relu, out_dtype):
    N = x_dense.shape[0]
    per_img = H * W * C * (2 + np.dtype(out_dtype).itemsize)
    Nb = _pick_nb(N, per_img)
    G = N // Nb
    return pl.pallas_call(
        functools.partial(bn_relu_kernel, apply_relu=apply_relu),
        grid=(G,),
        in_specs=[pl.BlockSpec((Nb, H, W * C), lambda n: (n, 0, 0)),
                  pl.BlockSpec((1, W * C), lambda n: (0, 0)),
                  pl.BlockSpec((1, W * C), lambda n: (0, 0))],
        out_specs=pl.BlockSpec((Nb, H, W * C), lambda n: (n, 0, 0)),
        out_shape=jax.ShapeDtypeStruct((N, H, W * C), out_dtype),
        compiler_params=pltpu.CompilerParams(
            dimension_semantics=("parallel",),
            vmem_limit_bytes=VMEM_LIMIT),
    )(x_dense, scale_t, shift_t)


# --------------------------------------------------------------------------- #
# Module-level forward
# --------------------------------------------------------------------------- #
def init_conv_block(key, nkernels):
    """Deterministic synthetic parameters matching ConvLayer's shapes."""
    params = []
    for i in range(len(nkernels) - 1):
        cin, cout = nkernels[i], nkernels[i + 1]
        key, kw, kb = jax.random.split(key, 3)
        # Conv2d weight (Cout, Cin, 3, 3) in torch -> stored as (3, 3, Cin, Cout).
        w = jax.random.normal(kw, (3, 3, cin, cout), jnp.float32) * 0.1
        b = jax.random.normal(kb, (cout,), jnp.float32) * 0.1   # cancelled by BN
        gamma = jnp.ones((cout,), jnp.float32)                  # BN weight init
        beta = jnp.zeros((cout,), jnp.float32)                  # BN bias init
        params.append((w, b, gamma, beta))
    return params


def conv_layer_forward(params, x_nchw, last_relu=True):
    """ConvLayer.forward — x_nchw: (N, C, H, W), train-mode BatchNorm."""
    N, C0, H, W = x_nchw.shape
    assert H >= 2 and W >= 2, "reflect padding with p=1 requires H, W >= 2"
    in_dtype = x_nchw.dtype

    c_raw = [C0] + [wk.shape[-1] for (wk, _b, _g, _bt) in params]
    c_pad = [_align_channels(c, W) for c in c_raw]            # W*C % 128 == 0

    # NCHW -> lane-dense channels-last (N, H, W*C0p), zero-pad channels, bf16.
    x = jnp.transpose(x_nchw, (0, 2, 3, 1))                   # (N, H, W, C0)
    if c_pad[0] > C0:
        x = jnp.pad(x, ((0, 0), (0, 0), (0, 0), (0, c_pad[0] - C0)))
    x = x.reshape(N, H, W * c_pad[0]).astype(jnp.bfloat16)

    count = N * H * W
    scale_t = jnp.ones((1, W * c_pad[0]), jnp.float32)        # identity, stage 0
    shift_t = jnp.zeros((1, W * c_pad[0]), jnp.float32)

    for i, (wk, _bias, gamma, beta) in enumerate(params):
        cin, cout = wk.shape[2], wk.shape[3]
        cin_p, cout_p = c_pad[i], c_pad[i + 1]
        wk_p = jnp.pad(wk, ((0, 0), (0, 0), (0, cin_p - cin), (0, cout_p - cout)))
        gamma_p = jnp.pad(gamma, (0, cout_p - cout), constant_values=1.0)
        beta_p = jnp.pad(beta, (0, cout_p - cout))
        w_fold = _fold_conv_weight(wk_p, W).astype(jnp.bfloat16)

        x, stats = _conv_stage(x, scale_t, shift_t, w_fold, H=H, W=W,
                               Cin=cin_p, Cout=cout_p, pre_norm_relu=(i > 0))
        scale, shift = _bn_scale_shift(stats, gamma_p, beta_p, count, W)
        scale_t = jnp.tile(scale, W).reshape(1, W * cout_p)
        shift_t = jnp.tile(shift, W).reshape(1, W * cout_p)

    # Final BatchNorm (+ ReLU iff last_relu) as a lane-dense elementwise kernel.
    c_last_p, c_last = c_pad[-1], c_raw[-1]
    y = _bn_relu_stage(x, scale_t, shift_t, H=H, W=W, C=c_last_p,
                       apply_relu=last_relu, out_dtype=in_dtype)

    # lane-dense (N, H, W*Cp) -> drop channel padding -> NCHW
    y = y.reshape(N, H, W, c_last_p)[..., :c_last]
    return jnp.transpose(y, (0, 3, 1, 2))


if __name__ == "__main__":
    key = jax.random.PRNGKey(0)
    k_param, k_x = jax.random.split(key)

    nkernels = [4, 8, 8]                          # ConvLayer(nkernels=[4, 8, 8])
    params = init_conv_block(k_param, nkernels)

    x = jax.random.normal(k_x, (2, 4, 16, 16), jnp.float32)   # NCHW

    fwd = jax.jit(functools.partial(conv_layer_forward, last_relu=True))
    out = fwd(params, x)
    out = jax.block_until_ready(out)
    assert out.shape == (2, 8, 16, 16), out.shape
    print("KERNEL_OK")
</pallas_src>

<mosaic_0001>
module attributes {stable_mosaic.version = 11 : i64} {
  func.func @conv_stats_kernel(%arg0: i32, %arg1: memref<1x16x128xbf16, #tpu.memory_space<vmem>>, %arg2: memref<1x128xf32, #tpu.memory_space<vmem>>, %arg3: memref<1x128xf32, #tpu.memory_space<vmem>>, %arg4: memref<384x128xbf16, #tpu.memory_space<vmem>>, %arg5: memref<1x16x128xbf16, #tpu.memory_space<vmem>>, %arg6: memref<1x2x128xf32, #tpu.memory_space<vmem>>) attributes {dimension_semantics = [#tpu.dimension_semantics<parallel>], iteration_bounds = array<i64: 2>, scalar_prefetch = 0 : i64, scratch_operands = 0 : i64, tpu.core_type = #tpu.core_type<tc>, window_params = [{transform_indices = @transform_0, window_bounds = array<i64: 1, 16, 128>}, {pipeline_mode = #tpu.pipeline_mode<synchronous>, transform_indices = @transform_1, window_bounds = array<i64: 1, 128>}, {pipeline_mode = #tpu.pipeline_mode<synchronous>, transform_indices = @transform_2, window_bounds = array<i64: 1, 128>}, {pipeline_mode = #tpu.pipeline_mode<synchronous>, transform_indices = @transform_3, window_bounds = array<i64: 384, 128>}, {transform_indices = @transform_4, window_bounds = array<i64: 1, 16, 128>}, {transform_indices = @transform_5, window_bounds = array<i64: 1, 2, 128>}]} {
    %c0 = arith.constant 0 : index
    %c0_0 = arith.constant 0 : index
    %c0_1 = arith.constant 0 : index
    %0 = vector.load %arg1[%c0, %c0_0, %c0_1] : memref<1x16x128xbf16, #tpu.memory_space<vmem>>, vector<1x16x128xbf16>
    %1 = vector.extract_strided_slice %0 {offsets = [0, 1, 0], sizes = [1, 1, 128], strides = [1, 1, 1]} : vector<1x16x128xbf16> to vector<1x1x128xbf16>
    %2 = vector.extract_strided_slice %0 {offsets = [0, 0, 0], sizes = [1, 15, 128], strides = [1, 1, 1]} : vector<1x16x128xbf16> to vector<1x15x128xbf16>
    %3 = tpu.concatenate %1, %2 in 1 : vector<1x1x128xbf16>, vector<1x15x128xbf16> -> vector<1x16x128xbf16>
    %4 = vector.extract_strided_slice %0 {offsets = [0, 1, 0], sizes = [1, 15, 128], strides = [1, 1, 1]} : vector<1x16x128xbf16> to vector<1x15x128xbf16>
    %5 = vector.extract_strided_slice %0 {offsets = [0, 14, 0], sizes = [1, 1, 128], strides = [1, 1, 1]} : vector<1x16x128xbf16> to vector<1x1x128xbf16>
    %6 = tpu.concatenate %4, %5 in 1 : vector<1x15x128xbf16>, vector<1x1x128xbf16> -> vector<1x16x128xbf16>
    %7 = tpu.concatenate %3, %0, %6 in 2 : vector<1x16x128xbf16>, vector<1x16x128xbf16>, vector<1x16x128xbf16> -> vector<1x16x384xbf16>
    %8 = vector.shape_cast %7 : vector<1x16x384xbf16> to vector<16x384xbf16>
    %c0_2 = arith.constant 0 : index
    %c0_3 = arith.constant 0 : index
    %9 = vector.load %arg4[%c0_2, %c0_3] : memref<384x128xbf16, #tpu.memory_space<vmem>>, vector<384x128xbf16>
    %cst = arith.constant dense<0.000000e+00> : vector<16x128xf32>
    %10 = tpu.matmul %8, %9, %cst {dimension_numbers = #tpu.dot_dimension_numbers<[1], [0], [0], [1], [0, 0, 1, 1], [], []>} : vector<16x384xbf16>, vector<384x128xbf16>, vector<16x128xf32> -> vector<16x128xf32>
    %cst_4 = arith.constant dense<0.000000e+00> : vector<128xf32>
    %11 = vector.multi_reduction <add>, %10, %cst_4 [0] : vector<16x128xf32> to vector<128xf32>
    %12 = vector.shape_cast %11 : vector<128xf32> to vector<1x128xf32>
    %13 = arith.mulf %10, %10 : vector<16x128xf32>
    %cst_5 = arith.constant dense<0.000000e+00> : vector<128xf32>
    %14 = vector.multi_reduction <add>, %13, %cst_5 [0] : vector<16x128xf32> to vector<128xf32>
    %15 = vector.shape_cast %14 : vector<128xf32> to vector<1x128xf32>
    %16 = tpu.concatenate %12, %15 in 0 : vector<1x128xf32>, vector<1x128xf32> -> vector<2x128xf32>
    %c0_6 = arith.constant 0 : index
    %c0_7 = arith.constant 0 : index
    %c0_8 = arith.constant 0 : index
    %17 = vector.load %arg6[%c0_6, %c0_7, %c0_8] : memref<1x2x128xf32, #tpu.memory_space<vmem>>, vector<1x2x128xf32>
    %18 = vector.shape_cast %17 : vector<1x2x128xf32> to vector<2x128xf32>
    %19 = vector.shape_cast %16 : vector<2x128xf32> to vector<1x2x128xf32>
    tpu.vector_store %arg6[%c0_6, %c0_7, %c0_8], %19 {strides = array<i32>} : memref<1x2x128xf32, #tpu.memory_space<vmem>>, vector<1x2x128xf32>,
    %20 = vector.shape_cast %10 : vector<16x128xf32> to vector<1x16x128xf32>
    %21 = arith.truncf %20 : vector<1x16x128xf32> to vector<1x16x128xbf16>
    %c0_9 = arith.constant 0 : index
    %c0_10 = arith.constant 0 : index
    %c0_11 = arith.constant 0 : index
    %22 = vector.load %arg5[%c0_9, %c0_10, %c0_11] : memref<1x16x128xbf16, #tpu.memory_space<vmem>>, vector<1x16x128xbf16>
    tpu.vector_store %arg5[%c0_9, %c0_10, %c0_11], %21 {strides = array<i32>} : memref<1x16x128xbf16, #tpu.memory_space<vmem>>, vector<1x16x128xbf16>,
    return
  }
  func.func @transform_0(%arg0: i32) -> (i32, i32, i32) {
    %c0_i32 = arith.constant 0 : i32
    %c0_i32_0 = arith.constant 0 : i32
    %c0_i32_1 = arith.constant 0 : i32
    return %arg0, %c0_i32, %c0_i32_0 : i32, i32, i32
  }
  func.func @transform_1(%arg0: i32) -> (i32, i32) {
    %c0_i32 = arith.constant 0 : i32
    %c0_i32_0 = arith.constant 0 : i32
    %c0_i32_1 = arith.constant 0 : i32
    return %c0_i32, %c0_i32_0 : i32, i32
  }
  func.func @transform_2(%arg0: i32) -> (i32, i32) {
    %c0_i32 = arith.constant 0 : i32
    %c0_i32_0 = arith.constant 0 : i32
    %c0_i32_1 = arith.constant 0 : i32
    return %c0_i32, %c0_i32_0 : i32, i32
  }
  func.func @transform_3(%arg0: i32) -> (i32, i32) {
    %c0_i32 = arith.constant 0 : i32
    %c0_i32_0 = arith.constant 0 : i32
    %c0_i32_1 = arith.constant 0 : i32
    return %c0_i32, %c0_i32_0 : i32, i32
  }
  func.func @transform_4(%arg0: i32) -> (i32, i32, i32) {
    %c0_i32 = arith.constant 0 : i32
    %c0_i32_0 = arith.constant 0 : i32
    %c0_i32_1 = arith.constant 0 : i32
    return %arg0, %c0_i32, %c0_i32_0 : i32, i32, i32
  }
  func.func @transform_5(%arg0: i32) -> (i32, i32, i32) {
    %c0_i32 = arith.constant 0 : i32
    %c0_i32_0 = arith.constant 0 : i32
    %c0_i32_1 = arith.constant 0 : i32
    return %arg0, %c0_i32, %c0_i32_0 : i32, i32, i32
  }
}

module attributes {stable_mosaic.version = 11 : i64} {
  func.func @conv_stats_kernel(%arg0: i32, %arg1: memref<1x16x128xbf16, #tpu.memory_space<vmem>>, %arg2: memref<1x128xf32, #tpu.memory_space<vmem>>, %arg3: memref<1x128xf32, #tpu.memory_space<vmem>>, %arg4: memref<384x128xbf16, #tpu.memory_space<vmem>>, %arg5: memref<1x16x128xbf16, #tpu.memory_space<vmem>>, %arg6: memref<1x2x128xf32, #tpu.memory_space<vmem>>) attributes {dimension_semantics = [#tpu.dimension_semantics<parallel>], iteration_bounds = array<i64: 2>, scalar_prefetch = 0 : i64, scratch_operands = 0 : i64, tpu.core_type = #tpu.core_type<tc>, window_params = [{transform_indices = @transform_0, window_bounds = array<i64: 1, 16, 128>}, {pipeline_mode = #tpu.pipeline_mode<synchronous>, transform_indices = @transform_1, window_bounds = array<i64: 1, 128>}, {pipeline_mode = #tpu.pipeline_mode<synchronous>, transform_indices = @transform_2, window_bounds = array<i64: 1, 128>}, {pipeline_mode = #tpu.pipeline_mode<synchronous>, transform_indices = @transform_3, window_bounds = array<i64: 384, 128>}, {transform_indices = @transform_4, window_bounds = array<i64: 1, 16, 128>}, {transform_indices = @transform_5, window_bounds = array<i64: 1, 2, 128>}]} {
    %c0 = arith.constant 0 : index
    %c0_0 = arith.constant 0 : index
    %c0_1 = arith.constant 0 : index
    %0 = vector.load %arg1[%c0, %c0_0, %c0_1] : memref<1x16x128xbf16, #tpu.memory_space<vmem>>, vector<1x16x128xbf16>
    %1 = arith.extf %0 : vector<1x16x128xbf16> to vector<1x16x128xf32>
    %c0_2 = arith.constant 0 : index
    %c0_3 = arith.constant 0 : index
    %2 = vector.load %arg2[%c0_2, %c0_3] : memref<1x128xf32, #tpu.memory_space<vmem>>, vector<1x128xf32>
    %3 = vector.shape_cast %2 : vector<1x128xf32> to vector<1x1x128xf32>
    %4 = vector.broadcast %3 : vector<1x1x128xf32> to vector<1x16x128xf32>
    %5 = arith.mulf %1, %4 : vector<1x16x128xf32>
    %c0_4 = arith.constant 0 : index
    %c0_5 = arith.constant 0 : index
    %6 = vector.load %arg3[%c0_4, %c0_5] : memref<1x128xf32, #tpu.memory_space<vmem>>, vector<1x128xf32>
    %7 = vector.shape_cast %6 : vector<1x128xf32> to vector<1x1x128xf32>
    %8 = vector.broadcast %7 : vector<1x1x128xf32> to vector<1x16x128xf32>
    %9 = arith.addf %5, %8 : vector<1x16x128xf32>
    %cst = arith.constant 0.000000e+00 : f32
    %10 = vector.broadcast %cst : f32 to vector<1x16x128xf32>
    %11 = arith.maximumf %9, %10 : vector<1x16x128xf32>
    %12 = arith.truncf %11 : vector<1x16x128xf32> to vector<1x16x128xbf16>
    %13 = vector.extract_strided_slice %12 {offsets = [0, 1, 0], sizes = [1, 1, 128], strides = [1, 1, 1]} : vector<1x16x128xbf16> to vector<1x1x128xbf16>
    %14 = vector.extract_strided_slice %12 {offsets = [0, 0, 0], sizes = [1, 15, 128], strides = [1, 1, 1]} : vector<1x16x128xbf16> to vector<1x15x128xbf16>
    %15 = tpu.concatenate %13, %14 in 1 : vector<1x1x128xbf16>, vector<1x15x128xbf16> -> vector<1x16x128xbf16>
    %16 = vector.extract_strided_slice %12 {offsets = [0, 1, 0], sizes = [1, 15, 128], strides = [1, 1, 1]} : vector<1x16x128xbf16> to vector<1x15x128xbf16>
    %17 = vector.extract_strided_slice %12 {offsets = [0, 14, 0], sizes = [1, 1, 128], strides = [1, 1, 1]} : vector<1x16x128xbf16> to vector<1x1x128xbf16>
    %18 = tpu.concatenate %16, %17 in 1 : vector<1x15x128xbf16>, vector<1x1x128xbf16> -> vector<1x16x128xbf16>
    %19 = tpu.concatenate %15, %12, %18 in 2 : vector<1x16x128xbf16>, vector<1x16x128xbf16>, vector<1x16x128xbf16> -> vector<1x16x384xbf16>
    %20 = vector.shape_cast %19 : vector<1x16x384xbf16> to vector<16x384xbf16>
    %c0_6 = arith.constant 0 : index
    %c0_7 = arith.constant 0 : index
    %21 = vector.load %arg4[%c0_6, %c0_7] : memref<384x128xbf16, #tpu.memory_space<vmem>>, vector<384x128xbf16>
    %cst_8 = arith.constant dense<0.000000e+00> : vector<16x128xf32>
    %22 = tpu.matmul %20, %21, %cst_8 {dimension_numbers = #tpu.dot_dimension_numbers<[1], [0], [0], [1], [0, 0, 1, 1], [], []>} : vector<16x384xbf16>, vector<384x128xbf16>, vector<16x128xf32> -> vector<16x128xf32>
    %cst_9 = arith.constant dense<0.000000e+00> : vector<128xf32>
    %23 = vector.multi_reduction <add>, %22, %cst_9 [0] : vector<16x128xf32> to vector<128xf32>
    %24 = vector.shape_cast %23 : vector<128xf32> to vector<1x128xf32>
    %25 = arith.mulf %22, %22 : vector<16x128xf32>
    %cst_10 = arith.constant dense<0.000000e+00> : vector<128xf32>
    %26 = vector.multi_reduction <add>, %25, %cst_10 [0] : vector<16x128xf32> to vector<128xf32>
    %27 = vector.shape_cast %26 : vector<128xf32> to vector<1x128xf32>
    %28 = tpu.concatenate %24, %27 in 0 : vector<1x128xf32>, vector<1x128xf32> -> vector<2x128xf32>
    %c0_11 = arith.constant 0 : index
    %c0_12 = arith.constant 0 : index
    %c0_13 = arith.constant 0 : index
    %29 = vector.load %arg6[%c0_11, %c0_12, %c0_13] : memref<1x2x128xf32, #tpu.memory_space<vmem>>, vector<1x2x128xf32>
    %30 = vector.shape_cast %29 : vector<1x2x128xf32> to vector<2x128xf32>
    %31 = vector.shape_cast %28 : vector<2x128xf32> to vector<1x2x128xf32>
    tpu.vector_store %arg6[%c0_11, %c0_12, %c0_13], %31 {strides = array<i32>} : memref<1x2x128xf32, #tpu.memory_space<vmem>>, vector<1x2x128xf32>,
    %32 = vector.shape_cast %22 : vector<16x128xf32> to vector<1x16x128xf32>
    %33 = arith.truncf %32 : vector<1x16x128xf32> to vector<1x16x128xbf16>
    %c0_14 = arith.constant 0 : index
    %c0_15 = arith.constant 0 : index
    %c0_16 = arith.constant 0 : index
    %34 = vector.load %arg5[%c0_14, %c0_15, %c0_16] : memref<1x16x128xbf16, #tpu.memory_space<vmem>>, vector<1x16x128xbf16>
    tpu.vector_store %arg5[%c0_14, %c0_15, %c0_16], %33 {strides = array<i32>} : memref<1x16x128xbf16, #tpu.memory_space<vmem>>, vector<1x16x128xbf16>,
    return
  }
  func.func @transform_0(%arg0: i32) -> (i32, i32, i32) {
    %c0_i32 = arith.constant 0 : i32
    %c0_i32_0 = arith.constant 0 : i32
    %c0_i32_1 = arith.constant 0 : i32
    return %arg0, %c0_i32, %c0_i32_0 : i32, i32, i32
  }
  func.func @transform_1(%arg0: i32) -> (i32, i32) {
    %c0_i32 = arith.constant 0 : i32
    %c0_i32_0 = arith.constant 0 : i32
    %c0_i32_1 = arith.constant 0 : i32
    return %c0_i32, %c0_i32_0 : i32, i32
  }
  func.func @transform_2(%arg0: i32) -> (i32, i32) {
    %c0_i32 = arith.constant 0 : i32
    %c0_i32_0 = arith.constant 0 : i32
    %c0_i32_1 = arith.constant 0 : i32
    return %c0_i32, %c0_i32_0 : i32, i32
  }
  func.func @transform_3(%arg0: i32) -> (i32, i32) {
    %c0_i32 = arith.constant 0 : i32
    %c0_i32_0 = arith.constant 0 : i32
    %c0_i32_1 = arith.constant 0 : i32
    return %c0_i32, %c0_i32_0 : i32, i32
  }
  func.func @transform_4(%arg0: i32) -> (i32, i32, i32) {
    %c0_i32 = arith.constant 0 : i32
    %c0_i32_0 = arith.constant 0 : i32
    %c0_i32_1 = arith.constant 0 : i32
    return %arg0, %c0_i32, %c0_i32_0 : i32, i32, i32
  }
  func.func @transform_5(%arg0: i32) -> (i32, i32, i32) {
    %c0_i32 = arith.constant 0 : i32
    %c0_i32_0 = arith.constant 0 : i32
    %c0_i32_1 = arith.constant 0 : i32
    return %arg0, %c0_i32, %c0_i32_0 : i32, i32, i32
  }
}

module attributes {stable_mosaic.version = 11 : i64} {
  func.func @bn_relu_kernel(%arg0: i32, %arg1: memref<1x16x128xbf16, #tpu.memory_space<vmem>>, %arg2: memref<1x128xf32, #tpu.memory_space<vmem>>, %arg3: memref<1x128xf32, #tpu.memory_space<vmem>>, %arg4: memref<1x16x128xf32, #tpu.memory_space<vmem>>) attributes {dimension_semantics = [#tpu.dimension_semantics<parallel>], iteration_bounds = array<i64: 2>, scalar_prefetch = 0 : i64, scratch_operands = 0 : i64, tpu.core_type = #tpu.core_type<tc>, window_params = [{transform_indices = @transform_0, window_bounds = array<i64: 1, 16, 128>}, {pipeline_mode = #tpu.pipeline_mode<synchronous>, transform_indices = @transform_1, window_bounds = array<i64: 1, 128>}, {pipeline_mode = #tpu.pipeline_mode<synchronous>, transform_indices = @transform_2, window_bounds = array<i64: 1, 128>}, {transform_indices = @transform_3, window_bounds = array<i64: 1, 16, 128>}]} {
    %c0 = arith.constant 0 : index
    %c0_0 = arith.constant 0 : index
    %c0_1 = arith.constant 0 : index
    %0 = vector.load %arg1[%c0, %c0_0, %c0_1] : memref<1x16x128xbf16, #tpu.memory_space<vmem>>, vector<1x16x128xbf16>
    %1 = arith.extf %0 : vector<1x16x128xbf16> to vector<1x16x128xf32>
    %c0_2 = arith.constant 0 : index
    %c0_3 = arith.constant 0 : index
    %2 = vector.load %arg2[%c0_2, %c0_3] : memref<1x128xf32, #tpu.memory_space<vmem>>, vector<1x128xf32>
    %3 = vector.shape_cast %2 : vector<1x128xf32> to vector<1x1x128xf32>
    %4 = vector.broadcast %3 : vector<1x1x128xf32> to vector<1x16x128xf32>
    %5 = arith.mulf %1, %4 : vector<1x16x128xf32>
    %c0_4 = arith.constant 0 : index
    %c0_5 = arith.constant 0 : index
    %6 = vector.load %arg3[%c0_4, %c0_5] : memref<1x128xf32, #tpu.memory_space<vmem>>, vector<1x128xf32>
    %7 = vector.shape_cast %6 : vector<1x128xf32> to vector<1x1x128xf32>
    %8 = vector.broadcast %7 : vector<1x1x128xf32> to vector<1x16x128xf32>
    %9 = arith.addf %5, %8 : vector<1x16x128xf32>
    %cst = arith.constant 0.000000e+00 : f32
    %10 = vector.broadcast %cst : f32 to vector<1x16x128xf32>
    %11 = arith.maximumf %9, %10 : vector<1x16x128xf32>
    %c0_6 = arith.constant 0 : index
    %c0_7 = arith.constant 0 : index
    %c0_8 = arith.constant 0 : index
    %12 = vector.load %arg4[%c0_6, %c0_7, %c0_8] : memref<1x16x128xf32, #tpu.memory_space<vmem>>, vector<1x16x128xf32>
    tpu.vector_store %arg4[%c0_6, %c0_7, %c0_8], %11 {strides = array<i32>} : memref<1x16x128xf32, #tpu.memory_space<vmem>>, vector<1x16x128xf32>,
    return
  }
  func.func @transform_0(%arg0: i32) -> (i32, i32, i32) {
    %c0_i32 = arith.constant 0 : i32
    %c0_i32_0 = arith.constant 0 : i32
    %c0_i32_1 = arith.constant 0 : i32
    return %arg0, %c0_i32, %c0_i32_0 : i32, i32, i32
  }
  func.func @transform_1(%arg0: i32) -> (i32, i32) {
    %c0_i32 = arith.constant 0 : i32
    %c0_i32_0 = arith.constant 0 : i32
    %c0_i32_1 = arith.constant 0 : i32
    return %c0_i32, %c0_i32_0 : i32, i32
  }
  func.func @transform_2(%arg0: i32) -> (i32, i32) {
    %c0_i32 = arith.constant 0 : i32
    %c0_i32_0 = arith.constant 0 : i32
    %c0_i32_1 = arith.constant 0 : i32
    return %c0_i32, %c0_i32_0 : i32, i32
  }
  func.func @transform_3(%arg0: i32) -> (i32, i32, i32) {
    %c0_i32 = arith.constant 0 : i32
    %c0_i32_0 = arith.constant 0 : i32
    %c0_i32_1 = arith.constant 0 : i32
    return %arg0, %c0_i32, %c0_i32_0 : i32, i32, i32
  }
}

</mosaic_0001>

<bundles_post_ra>
// kernel: conv_layer_forward.3
= control target key start
LH: loop header
LB: loop body
LE: loop exit
PB: predicated region body
PF: predicated region fallthrough
CT: control target
= control target key end

     0   :  { %s842_s18 = smov 0   ;;  %s959_s0 = inlined_call_operand.vmem [shape: bf16[2,16,128], index: 0, kind: input, shape index: {}]   ;;  %s960_s1 = inlined_call_operand.vmem [shape: f32[1,128], index: 1, kind: input, shape index: {}]   ;;  %s961_s2 = inlined_call_operand.vmem [shape: f32[1,128], index: 2, kind: input, shape index: {}]   ;;  %s962_s3 = inlined_call_operand.vmem [shape: bf16[384,128], index: 3, kind: input, shape index: {}]   ;;  %s963_s4 = inlined_call_operand.vmem [shape: bf16[2,16,128], index: 4, kind: output, shape index: {0}]   ;;  %s964_s5 = inlined_call_operand.vmem [shape: f32[2,2,128], index: 5, kind: output, shape index: {1}]  }
   0x1 LB: > { %s664_s1 = sadd.s32 4294967295, %s808_s18   ;;  %p668_p0 = scmp.ge.s32.totalorder %s808_s18, 1  ;;  %s808_s18 = sphi %s842_s18, %s16_s18  }
   0x2   : > { %p190_p1 = scmp.lt.s32.totalorder %s808_s18, 3 }
   0x4   : > { %p191_p2 = pnand %p668_p0, %p190_p1 }
   0x5   : > { %p222_p3 = scmp.lt.s32.totalorder (!%p191_p2), %s664_s1, 1 }
   0x6   : > { %194 = sbr.rel (%p191_p2) target bundleno = 266 (0x10a), region = 36 }
   0xb   : > { %v775_v0 = vld [vmem:[%s962_s3 + $0x78] sm:$0xff]   ;;  %v810_v1 = vmov 0.0   ;;  %vm811_vm0 = vmmov 0   ;;  %v778_v4 = vld [vmem:[%s962_s3 + $0x70] sm:$0xff]   ;;  %v781_v7 = vld [vmem:[%s962_s3 + $0x68] sm:$0xff]   ;;  %s966_s1 = smov (!%p222_p3, %s664_s1), 1 }
   0xc   : > { %745 = vmatprep.subr.bf16.mxu1 %v810_v1  ;;  %v776_v2 = vld [vmem:[%s962_s3 + $0xb8] sm:$0xff]   ;;  %714 = vmatprep.subr.bf16.mxu0 %v775_v0  ;;  %v779_v5 = vld [vmem:[%s962_s3 + $0xb0] sm:$0xff]   ;;  %v782_v8 = vld [vmem:[%s962_s3 + $0xa8] sm:$0xff]   ;;  %s705_s25 = sshll.u32 %s966_s1, 3  ;;  %vm270_vm1 = vcmask 1047552   ;;  %vm257_vm3 = vcmask 1040384  }
   0xd   : > { %v777_v3 = vld [vmem:[%s962_s3 + $0x38] sm:$0xff]   ;;  %761 = vmatprep.mubr.msk.bf16.mxu1 %vm811_vm0, %v810_v1  ;;  %746 = vmatpush3.bf16.msra.mxu1 %v776_v2  ;;  %v780_v6 = vld [vmem:[%s962_s3 + $0x30] sm:$0xff]   ;;  %v783_v9 = vld [vmem:[%s962_s3 + $0x28] sm:$0xff]   ;;  %s226_s9 = scalar_lea.vmem %s959_s0, %s705_s25  ;;  %vm271_vm2 = vsmask.f32 7424  ;;  %s231_s22 = scalar_lea.vmem %s963_s4, %s705_s25 }
   0xe   : > { %715 = vmatpush3.bf16.msra.mxu0 %v777_v3  ;;  %747 = vmatprep.subr.bf16.mxu1 %v810_v1  ;;  %v784_v10 = vld [vmem:[%s962_s3 + $0x60] sm:$0xff]   ;;  %v787_v13 = vld [vmem:[%s962_s3 + $0x58] sm:$0xff]   ;;  %v790_v16 = vld [vmem:[%s962_s3 + $0x50] sm:$0xff]   ;;  %vm258_vm4 = vsmask.f32 256  ;;  %s673_s23 = sshll.u32 %s966_s1, 1 }
   0xf   : > { %716 = vmatprep.subr.bf16.mxu0 %v778_v4  ;;  %v785_v11 = vld [vmem:[%s962_s3 + $0xa0] sm:$0xff]   ;;  %v788_v14 = vld [vmem:[%s962_s3 + $0x98] sm:$0xff]   ;;  %v791_v17 = vld [vmem:[%s962_s3 + $0x90] sm:$0xff]   ;;  %s235_s26 = scalar_lea.vmem %s964_s5, %s673_s23 }
  0x10   : > { %v786_v12 = vld [vmem:[%s962_s3 + $0x20] sm:$0xff]   ;;  %v789_v15 = vld [vmem:[%s962_s3 + $0x18] sm:$0xff]   ;;  %v792_v18 = vld [vmem:[%s962_s3 + $0x10] sm:$0xff]  }
  0x11   : > { %748 = vmatpush3.bf16.msra.mxu1 %v779_v5  ;;  %v793_v19 = vld [vmem:[%s962_s3 + $0x48] sm:$0xff]   ;;  %v237_v22 = vld [vmem:[%s226_s9] sm:$0xf]  ;;  %v238_v23 = vld [vmem:[%s226_s9 + $0x4] sm:$0xf] }
  0x12   : > { %717 = vmatpush3.bf16.msra.mxu0 %v780_v6  ;;  %749 = vmatprep.subr.bf16.mxu1 %v810_v1  ;;  %v794_v20 = vld [vmem:[%s962_s3 + $0x88] sm:$0xff]   ;;  %v796_v24 = vld [vmem:[%s962_s3 + $0x40] sm:$0xff]   ;;  %v674_v25 = vcombine.low %v237_v22, %v237_v22  ;;  %v675_v26 = vcombine.low %v237_v22, %v238_v23  ;;  %v676_v27 = vcombine.low %v238_v23, %v238_v23  ;;  %vm272_vm5 = vmand %vm270_vm1, %vm271_vm2 }
  0x13   : > { %718 = vmatprep.subr.bf16.mxu0 %v781_v7  ;;  %v795_v21 = vld [vmem:[%s962_s3 + $0x8] sm:$0xff]   ;;  %v797_v28 = vld [vmem:[%s962_s3 + $0x80] sm:$0xff]   ;;  %vm259_vm6 = vmand %vm257_vm3, %vm258_vm4 }
  0x14   : > { %v253_v29 = vshll.u32 %v675_v26, 16  ;;  %v266_v30 = vshll.u32 %v676_v27, 16  ;;  %499 = vmatprep.mubr.bf16.mxu0 %v675_v26  ;;  %v250_v31 = vshrl.u32 %v675_v26, 16  ;;  %v798_v32 = vld [vmem:[%s962_s3] sm:$0xff]   ;;  %v243_v35 = vshrl.u32 %v674_v25, 16 }
  0x15   : > { %750 = vmatpush3.bf16.msra.mxu1 %v782_v8 }
  0x16   : > { %719 = vmatpush3.bf16.msra.mxu0 %v783_v9  ;;  %751 = vmatprep.subr.bf16.mxu1 %v810_v1  ;;  %v261_v33 = vrot.slane %v253_v29, 1  ;;  %v268_v34 = vrot.slane %v266_v30, 4  ;;  %v252_v36 = vrot.slane %v250_v31, 7 }
  0x17   : > { %720 = vmatprep.subr.bf16.mxu0 %v784_v10 }
  0x18   : > { %v262_v37 = vor.u32 %v261_v33, %v250_v31  ;;  %v255_v38 = vor.u32 %v253_v29, %v252_v36 }
  0x19   : > { %752 = vmatpush3.bf16.msra.mxu1 %v785_v11 }
  0x1a   : > { %721 = vmatpush3.bf16.msra.mxu0 %v786_v12  ;;  %753 = vmatprep.subr.bf16.mxu1 %v810_v1  ;;  %v273_v39 = vsel %vm272_vm5, %v262_v37, %v268_v34  ;;  %v260_v40 = vsel %vm259_vm6, %v243_v35, %v255_v38 }
  0x1b   : > { %722 = vmatprep.subr.bf16.mxu0 %v787_v13 }
  0x1d   : > { %754 = vmatpush3.bf16.msra.mxu1 %v788_v14 }
  0x1e   : > { %723 = vmatpush3.bf16.msra.mxu0 %v789_v15  ;;  %755 = vmatprep.subr.bf16.mxu1 %v810_v1 }
  0x1f   : > { %724 = vmatprep.subr.bf16.mxu0 %v790_v16 }
  0x21   : > { %756 = vmatpush3.bf16.msra.mxu1 %v791_v17 }
  0x22   : > { %725 = vmatpush3.bf16.msra.mxu0 %v792_v18  ;;  %757 = vmatprep.subr.bf16.mxu1 %v810_v1 }
  0x23   : > { %726 = vmatprep.subr.bf16.mxu0 %v793_v19 }
  0x25   : > { %758 = vmatpush3.bf16.msra.mxu1 %v794_v20 }
  0x26   : > { %727 = vmatpush3.bf16.msra.mxu0 %v795_v21  ;;  %759 = vmatprep.subr.bf16.mxu1 %v810_v1 }
  0x27   : > { %728 = vmatprep.subr.bf16.mxu0 %v796_v24 }
  0x29   : > { %760 = vmatpush3.bf16.msra.mxu1 %v797_v28 }
  0x2a   : > { %729 = vmatpush3.bf16.msra.mxu0 %v798_v32 }
  0x2c   : > { %762 = vmatmul.mubr.bf16.vlgmr.msra.gmra.mxu1 %v273_v39 }
  0x2d   : > { %500 = vmatmul.mubr.bf16.vlgmr.msra.gmra.mxu0 %v260_v40 }
  0xec   : > { %v542_v41 = vpop.f32.mrf.mxu1 }
  0xed   : > { %v730_v42 = vpop.f32.mrf.mxu0 }
  0xee   : > { %v763_v43 = vpop.f32.mrf.mxu1 }
  0xef   : > { %v731_v44 = vpop.f32.mrf.mxu0 }
  0xf0   : > { %v732_v45 = vadd.f32 %v731_v44, %v730_v42  ;;  %v545_v46 = vpop.f32.mrf.mxu1 }
  0xf1   : > { %v733_v47 = vpop.f32.mrf.mxu0 }
  0xf2   : > { %v764_v48 = vpop.f32.mrf.mxu1  ;;  %v543_v50 = vadd.f32 %v732_v45, %v542_v41 }
  0xf3   : > { %v734_v49 = vpop.f32.mrf.mxu0 }
  0xf4   : > { %v735_v51 = vadd.f32 %v734_v49, %v733_v47  ;;  %v556_v53 = vmul.f32 %v543_v50, %v543_v50 }
  0xf6   : > { %v546_v52 = vadd.f32 %v735_v51, %v545_v46 }
  0xf8   : > { %v549_v54 = vadd.f32 %v546_v52, %v543_v50  ;;  %v557_v55 = vmul.f32 %v546_v52, %v546_v52  ;;  %v712_v56 = vpack.c.bf16 %v546_v52, %v543_v50 }
  0xfa   : > { %v550_v57 = vrot.slane %v549_v54, 4  ;;  %v558_v58 = vadd.f32 %v557_v55, %v556_v53  ;;  %713 = vst [vmem:[%s231_s22] sm:$0xff] %v712_v56  }
  0xfc   : > { %v551_v59 = vadd.f32 %v550_v57, %v549_v54  ;;  %v559_v60 = vrot.slane %v558_v58, 4 }
  0xfe   : > { %v552_v61 = vrot.slane %v551_v59, 2  ;;  %v560_v62 = vadd.f32 %v559_v60, %v558_v58 }
 0x100   : > { %v553_v63 = vadd.f32 %v552_v61, %v551_v59  ;;  %v561_v0 = vrot.slane %v560_v62, 2 }
 0x102   : > { %v554_v1 = vrot.slane %v553_v63, 1  ;;  %v562_v2 = vadd.f32 %v561_v0, %v560_v62 }
 0x104   : > { %v563_v3 = vrot.slane %v562_v2, 1  ;;  %v555_v4 = vadd.f32 %v554_v1, %v553_v63 }
 0x106   : > { %v564_v5 = vadd.f32 %v563_v3, %v562_v2 }
 0x108   : > { %v566_v6 = vsel %vm257_vm3, %v555_v4, %v564_v5 }
 0x109   : > { %567 = vst [vmem:[%s235_s26] sm:$0x3] %v566_v6 }
 0x10a PF: > { %s16_s18 = sadd.s32 1, %s808_s18  }
 0x10b   : > { %p13_p4 = scmp.ge.s32.totalorder %s16_s18, 4  }
 0x10d   :  { %15 = sbr.rel (!%p13_p4) target bundleno = 1 (0x1), region = 78 }

// kernel: tile.28
= control target key start
LH: loop header
LB: loop body
LE: loop exit
PB: predicated region body
PF: predicated region fallthrough
CT: control target
= control target key end

     0   :  { %s28_s0 = inlined_call_operand.vmem [shape: f32[8], index: 0, kind: input, shape index: {}]   ;;  %s29_s1 = inlined_call_operand.vmem [shape: f32[16,8], index: 1, kind: output, shape index: {}]  }
   0x1   :  { %v4_v0 = vld [vmem:[%s28_s0] ss:$0 sm:$0xff] }
   0x2   :  { %5 = vst [vmem:[%s29_s1] sm:$0xff] %v4_v0  ;;  %8 = vst [vmem:[%s29_s1 + $0x8] sm:$0xff] %v4_v0 }

// kernel: tile.29
= control target key start
LH: loop header
LB: loop body
LE: loop exit
PB: predicated region body
PF: predicated region fallthrough
CT: control target
= control target key end

     0   :  { %s133_s10 = smov 120   ;;  %s134_s11 = smov 104   ;;  %vm3_vm0 = vcmask 64512   ;;  %vm9_vm1 = vcmask 1048512   ;;  %vm15_vm2 = vcmask 982912   ;;  %vm21_vm3 = vcmask 917312   ;;  %s209_s0 = inlined_call_operand.vmem [shape: f32[16,8], index: 0, kind: input, shape index: {}]   ;;  %s210_s1 = inlined_call_operand.vmem [shape: f32[1,128], index: 1, kind: output, shape index: {}]  }
   0x1   :  { %v103_v0 = vld [vmem:[%s209_s0 + $0xf] sm:$0x1]   ;;  %v105_v1 = vld [vmem:[%s209_s0 + $0xd] sm:$0x1]   ;;  %v104_v2 = vld [vmem:[%s209_s0 + $0xe] sm:$0x1]  }
   0x2   :  { %7 = vrot.lane.b32.xlu0 %v103_v0, %s133_s10  ;;  %19 = vrot.lane.b32.xlu1 %v105_v1, %s134_s11  ;;  %v106_v3 = vld [vmem:[%s209_s0 + $0xc] sm:$0x1]   ;;  %s135_s16 = smov 112   ;;  %s136_s17 = smov 96   ;;  %v107_v4 = vld [vmem:[%s209_s0 + $0xb] sm:$0x1]  }
   0x3   :  { %v108_v5 = vld [vmem:[%s209_s0 + $0xa] sm:$0x1]   ;;  %v2_v6 = vld [vmem:[%s209_s0] sm:$0x1]   ;;  %s137_s24 = smov 88   ;;  %s138_s25 = smov 80  }
   0x4   :  { %4 = vst.msk [vmem:[#allocation0] sm:$0x1] %vm3_vm0, %v2_v6   ;;  %v109_v7 = vld [vmem:[%s209_s0 + $0x9] sm:$0x1]   ;;  %v110_v8 = vld [vmem:[%s209_s0 + $0x8] sm:$0x1]  }
   0x5   :  { %s139_s30 = smov 72   ;;  %s140_s2 = smov 64   ;;  %v111_v9 = vld [vmem:[%s209_s0 + $0x7] sm:$0x1]   ;;  %v112_v10 = vld [vmem:[%s209_s0 + $0x6] sm:$0x1]  }
   0x6   :  { %13 = vrot.lane.b32.xlu0 %v104_v2, %s135_s16  ;;  %25 = vrot.lane.b32.xlu1 %v106_v3, %s136_s17  ;;  %s141_s7 = smov 56   ;;  %s142_s8 = smov 48   ;;  %v113_v11 = vld [vmem:[%s209_s0 + $0x5] sm:$0x1]   ;;  %v114_v12 = vld [vmem:[%s209_s0 + $0x4] sm:$0x1]  }
   0x7   :  { %s143_s13 = smov 40   ;;  %s144_s14 = smov 32   ;;  %v115_v13 = vld [vmem:[%s209_s0 + $0x3] sm:$0x1]   ;;  %v116_v14 = vld [vmem:[%s209_s0 + $0x2] sm:$0x1]  }
   0x8   :  { %s145_s19 = smov 24   ;;  %s146_s20 = smov 16   ;;  %v117_v15 = vld [vmem:[%s209_s0 + $0x1] sm:$0x1]   ;;  %vm27_vm4 = vcmask 851712   ;;  %vm33_vm5 = vcmask 786112  }
   0x9   :  { %s147_s0 = smov 8   ;;  %vm39_vm6 = vcmask 720512   ;;  %vm45_vm7 = vcmask 654912   ;;  %vm51_vm8 = vcmask 589312   ;;  %vm57_vm9 = vcmask 523712  }
   0xa   :  { %31 = vrot.lane.b32.xlu0 %v107_v4, %s137_s24  ;;  %37 = vrot.lane.b32.xlu1 %v108_v5, %s138_s25  ;;  %vm63_vm10 = vcmask 458112   ;;  %vm69_vm11 = vcmask 392512   ;;  %vm75_vm12 = vcmask 326912   ;;  %vm81_vm13 = vcmask 261312  }
   0xb   :  { %vm87_vm14 = vcmask 195712   ;;  %vm93_vm15 = vcmask 130112  }
   0xe   :  { %43 = vrot.lane.b32.xlu0 %v109_v7, %s139_s30  ;;  %49 = vrot.lane.b32.xlu1 %v110_v8, %s140_s2 }
  0x12   :  { %55 = vrot.lane.b32.xlu0 %v111_v9, %s141_s7  ;;  %61 = vrot.lane.b32.xlu1 %v112_v10, %s142_s8 }
  0x16   :  { %67 = vrot.lane.b32.xlu0 %v113_v11, %s143_s13  ;;  %73 = vrot.lane.b32.xlu1 %v114_v12, %s144_s14 }
  0x1a   :  { %79 = vrot.lane.b32.xlu0 %v115_v13, %s145_s19  ;;  %85 = vrot.lane.b32.xlu1 %v116_v14, %s146_s20 }
  0x1e   :  { %91 = vrot.lane.b32.xlu0 %v117_v15, %s147_s0 }
  0x74   :  { %v8_v16 = vpop.permute.xlu0 %7   ;;  %v20_v17 = vpop.permute.xlu1 %19  }
  0x75   :  { %10 = vst.msk [vmem:[#allocation0] sm:$0x1] %vm9_vm1, %v8_v16  }
  0x78   :  { %v14_v18 = vpop.permute.xlu0 %13   ;;  %v26_v19 = vpop.permute.xlu1 %25  }
  0x79   :  { %16 = vst.msk [vmem:[#allocation0] sm:$0x1] %vm15_vm2, %v14_v18  }
  0x7a   :  { %22 = vst.msk [vmem:[#allocation0] sm:$0x1] %vm21_vm3, %v20_v17  }
  0x7b   :  { %28 = vst.msk [vmem:[#allocation0] sm:$0x1] %vm27_vm4, %v26_v19  }
  0x7c   :  { %v32_v20 = vpop.permute.xlu0 %31   ;;  %v38_v21 = vpop.permute.xlu1 %37  }
  0x7d   :  { %34 = vst.msk [vmem:[#allocation0] sm:$0x1] %vm33_vm5, %v32_v20  }
  0x7e   :  { %40 = vst.msk [vmem:[#allocation0] sm:$0x1] %vm39_vm6, %v38_v21  }
  0x80   :  { %v44_v22 = vpop.permute.xlu0 %43   ;;  %v50_v23 = vpop.permute.xlu1 %49  }
  0x81   :  { %46 = vst.msk [vmem:[#allocation0] sm:$0x1] %vm45_vm7, %v44_v22  }
  0x82   :  { %52 = vst.msk [vmem:[#allocation0] sm:$0x1] %vm51_vm8, %v50_v23  }
  0x84   :  { %v56_v24 = vpop.permute.xlu0 %55   ;;  %v62_v25 = vpop.permute.xlu1 %61  }
  0x85   :  { %58 = vst.msk [vmem:[#allocation0] sm:$0x1] %vm57_vm9, %v56_v24  }
  0x86   :  { %64 = vst.msk [vmem:[#allocation0] sm:$0x1] %vm63_vm10, %v62_v25  }
  0x88   :  { %v68_v26 = vpop.permute.xlu0 %67   ;;  %v74_v27 = vpop.permute.xlu1 %73  }
  0x89   :  { %70 = vst.msk [vmem:[#allocation0] sm:$0x1] %vm69_vm11, %v68_v26  }
  0x8a   :  { %76 = vst.msk [vmem:[#allocation0] sm:$0x1] %vm75_vm12, %v74_v27  }
  0x8c   :  { %v80_v28 = vpop.permute.xlu0 %79   ;;  %v86_v29 = vpop.permute.xlu1 %85  }
  0x8d   :  { %82 = vst.msk [vmem:[#allocation0] sm:$0x1] %vm81_vm13, %v80_v28  }
  0x8e   :  { %88 = vst.msk [vmem:[#allocation0] sm:$0x1] %vm87_vm14, %v86_v29  }
  0x90   :  { %v92_v30 = vpop.permute.xlu0 %91  }
  0x91   :  { %94 = vst.msk [vmem:[#allocation0] sm:$0x1] %vm93_vm15, %v92_v30  }
  0x98   :  { %v99_v31 = vld [vmem:[#allocation0] sm:$0x1] }
  0x99   :  { %102 = vst [vmem:[%s210_s1] sm:$0x1] %v99_v31 }

// kernel: conv_layer_forward.4
= control target key start
LH: loop header
LB: loop body
LE: loop exit
PB: predicated region body
PF: predicated region fallthrough
CT: control target
= control target key end

     0   :  { %s850_s18 = smov 0   ;;  %s971_s0 = inlined_call_operand.vmem [shape: bf16[2,16,128], index: 0, kind: input, shape index: {}]   ;;  %s972_s1 = inlined_call_operand.vmem [shape: f32[1,128], index: 1, kind: input, shape index: {}]   ;;  %s973_s2 = inlined_call_operand.vmem [shape: f32[1,128], index: 2, kind: input, shape index: {}]   ;;  %s974_s3 = inlined_call_operand.vmem [shape: bf16[384,128], index: 3, kind: input, shape index: {}]   ;;  %s975_s4 = inlined_call_operand.vmem [shape: bf16[2,16,128], index: 4, kind: output, shape index: {0}]   ;;  %s976_s5 = inlined_call_operand.vmem [shape: f32[2,2,128], index: 5, kind: output, shape index: {1}]  }
   0x1 LB: > { %s672_s19 = sadd.s32 4294967295, %s816_s18   ;;  %p676_p0 = scmp.ge.s32.totalorder %s816_s18, 1  ;;  %s816_s18 = sphi %s850_s18, %s16_s18  }
   0x2   : > { %p190_p1 = scmp.lt.s32.totalorder %s816_s18, 3 }
   0x4   : > { %p191_p2 = pnand %p676_p0, %p190_p1 }
   0x5   : > { %p222_p3 = scmp.lt.s32.totalorder (!%p191_p2), %s672_s19, 1 }
   0x6   : > { %194 = sbr.rel (%p191_p2) target bundleno = 266 (0x10a), region = 36 }
   0xb   : > { %v786_v0 = vld [vmem:[%s974_s3 + $0x78] sm:$0xff]   ;;  %v818_v1 = vmov 0.0   ;;  %vm819_vm0 = vmmov 0   ;;  %v789_v4 = vld [vmem:[%s974_s3 + $0x70] sm:$0xff]   ;;  %v792_v7 = vld [vmem:[%s974_s3 + $0x68] sm:$0xff]   ;;  %s978_s19 = smov (!%p222_p3, %s672_s19), 1 }
   0xc   : > { %756 = vmatprep.subr.bf16.mxu1 %v818_v1  ;;  %v787_v2 = vld [vmem:[%s974_s3 + $0xb8] sm:$0xff]   ;;  %725 = vmatprep.subr.bf16.mxu0 %v786_v0  ;;  %v790_v5 = vld [vmem:[%s974_s3 + $0xb0] sm:$0xff]   ;;  %v793_v8 = vld [vmem:[%s974_s3 + $0xa8] sm:$0xff]   ;;  %s712_s29 = sshll.u32 %s978_s19, 3  ;;  %vm279_vm1 = vcmask 1047552   ;;  %vm271_vm3 = vcmask 1040384  }
   0xd   : > { %v788_v3 = vld [vmem:[%s974_s3 + $0x38] sm:$0xff]   ;;  %772 = vmatprep.mubr.msk.bf16.mxu1 %vm819_vm0, %v818_v1  ;;  %757 = vmatpush3.bf16.msra.mxu1 %v787_v2  ;;  %v791_v6 = vld [vmem:[%s974_s3 + $0x30] sm:$0xff]   ;;  %v794_v9 = vld [vmem:[%s974_s3 + $0x28] sm:$0xff]   ;;  %s226_s13 = scalar_lea.vmem %s971_s0, %s712_s29  ;;  %vm280_vm2 = vsmask.f32 7424  ;;  %s231_s8 = scalar_lea.vmem %s975_s4, %s712_s29 }
   0xe   : > { %726 = vmatpush3.bf16.msra.mxu0 %v788_v3  ;;  %758 = vmatprep.subr.bf16.mxu1 %v818_v1  ;;  %v795_v10 = vld [vmem:[%s974_s3 + $0x60] sm:$0xff]   ;;  %v798_v13 = vld [vmem:[%s974_s3 + $0x58] sm:$0xff]   ;;  %v801_v16 = vld [vmem:[%s974_s3 + $0x50] sm:$0xff]   ;;  %vm272_vm4 = vsmask.f32 256  ;;  %s681_s9 = sshll.u32 %s978_s19, 1 }
   0xf   : > { %727 = vmatprep.subr.bf16.mxu0 %v789_v4  ;;  %v796_v11 = vld [vmem:[%s974_s3 + $0xa0] sm:$0xff]   ;;  %v799_v14 = vld [vmem:[%s974_s3 + $0x98] sm:$0xff]   ;;  %v802_v17 = vld [vmem:[%s974_s3 + $0x90] sm:$0xff]   ;;  %s235_s11 = scalar_lea.vmem %s976_s5, %s681_s9 }
  0x10   : > { %v797_v12 = vld [vmem:[%s974_s3 + $0x20] sm:$0xff]   ;;  %v800_v15 = vld [vmem:[%s974_s3 + $0x18] sm:$0xff]   ;;  %v803_v18 = vld [vmem:[%s974_s3 + $0x10] sm:$0xff]  }
  0x11   : > { %759 = vmatpush3.bf16.msra.mxu1 %v790_v5  ;;  %v804_v19 = vld [vmem:[%s974_s3 + $0x48] sm:$0xff]   ;;  %v717_v22 = vld [vmem:[%s226_s13] sm:$0xff]   ;;  %vm281_vm5 = vmand %vm279_vm1, %vm280_vm2 }
  0x12   : > { %728 = vmatpush3.bf16.msra.mxu0 %v791_v6  ;;  %760 = vmatprep.subr.bf16.mxu1 %v818_v1  ;;  %v805_v20 = vld [vmem:[%s974_s3 + $0x88] sm:$0xff]   ;;  %v682_v23 = vld [vmem:[%s972_s1] ss:$0 sm:$0xff]  ;;  %v718_v25 = vunpack.c.l.bf16 %v717_v22  ;;  %v719_v26 = vunpack.c.h.bf16 %v717_v22  ;;  %vm273_vm6 = vmand %vm271_vm3, %vm272_vm4 }
  0x13   : > { %729 = vmatprep.subr.bf16.mxu0 %v792_v7  ;;  %v806_v21 = vld [vmem:[%s974_s3 + $0x8] sm:$0xff]   ;;  %v807_v24 = vld [vmem:[%s974_s3 + $0x40] sm:$0xff]  }
  0x14   : > { %v683_v27 = vld [vmem:[%s973_s2] ss:$0 sm:$0xff]  ;;  %v248_v29 = vmul.f32 %v718_v25, %v682_v23  ;;  %v249_v30 = vmul.f32 %v719_v26, %v682_v23 }
  0x15   : > { %761 = vmatpush3.bf16.msra.mxu1 %v793_v8  ;;  %v808_v28 = vld [vmem:[%s974_s3 + $0x80] sm:$0xff]  }
  0x16   : > { %730 = vmatpush3.bf16.msra.mxu0 %v794_v9  ;;  %762 = vmatprep.subr.bf16.mxu1 %v818_v1  ;;  %v809_v31 = vld [vmem:[%s974_s3] sm:$0xff]   ;;  %v257_v32 = vadd.f32 %v683_v27, %v248_v29  ;;  %v258_v33 = vadd.f32 %v683_v27, %v249_v30 }
  0x17   : > { %731 = vmatprep.subr.bf16.mxu0 %v795_v10 }
  0x18   : > { %v259_v34 = vmax.f32 %v257_v32, 0.0  ;;  %v260_v35 = vmax.f32 %v258_v33, 0.0 }
  0x19   : > { %763 = vmatpush3.bf16.msra.mxu1 %v796_v11 }
  0x1a   : > { %732 = vmatpush3.bf16.msra.mxu0 %v797_v12  ;;  %764 = vmatprep.subr.bf16.mxu1 %v818_v1  ;;  %v261_v36 = vpack.c.bf16 %v260_v35, %v259_v34 }
  0x1b   : > { %733 = vmatprep.subr.bf16.mxu0 %v798_v13 }
  0x1c   : > { %v263_v37 = vshrl.u32 %v261_v36, 16  ;;  %507 = vmatprep.mubr.bf16.mxu0 %v261_v36  ;;  %v267_v38 = vshll.u32 %v261_v36, 16 }
  0x1d   : > { %765 = vmatpush3.bf16.msra.mxu1 %v799_v14 }
  0x1e   : > { %734 = vmatpush3.bf16.msra.mxu0 %v800_v15  ;;  %766 = vmatprep.subr.bf16.mxu1 %v818_v1  ;;  %v275_v39 = vrot.slane %v267_v38, 1  ;;  %v266_v40 = vrot.slane %v263_v37, 7 }
  0x1f   : > { %735 = vmatprep.subr.bf16.mxu0 %v801_v16 }
  0x20   : > { %v276_v41 = vor.u32 %v275_v39, %v263_v37  ;;  %v269_v42 = vor.u32 %v267_v38, %v266_v40 }
  0x21   : > { %767 = vmatpush3.bf16.msra.mxu1 %v802_v17 }
  0x22   : > { %736 = vmatpush3.bf16.msra.mxu0 %v803_v18  ;;  %768 = vmatprep.subr.bf16.mxu1 %v818_v1  ;;  %v282_v43 = vsel %vm281_vm5, %v276_v41, %v267_v38  ;;  %v274_v44 = vsel %vm273_vm6, %v263_v37, %v269_v42 }
  0x23   : > { %737 = vmatprep.subr.bf16.mxu0 %v804_v19 }
  0x25   : > { %769 = vmatpush3.bf16.msra.mxu1 %v805_v20 }
  0x26   : > { %738 = vmatpush3.bf16.msra.mxu0 %v806_v21  ;;  %770 = vmatprep.subr.bf16.mxu1 %v818_v1 }
  0x27   : > { %739 = vmatprep.subr.bf16.mxu0 %v807_v24 }
  0x29   : > { %771 = vmatpush3.bf16.msra.mxu1 %v808_v28 }
  0x2a   : > { %740 = vmatpush3.bf16.msra.mxu0 %v809_v31 }
  0x2c   : > { %773 = vmatmul.mubr.bf16.vlgmr.msra.gmra.mxu1 %v282_v43 }
  0x2d   : > { %508 = vmatmul.mubr.bf16.vlgmr.msra.gmra.mxu0 %v274_v44 }
  0xec   : > { %v550_v45 = vpop.f32.mrf.mxu1 }
  0xed   : > { %v741_v46 = vpop.f32.mrf.mxu0 }
  0xee   : > { %v774_v47 = vpop.f32.mrf.mxu1 }
  0xef   : > { %v742_v48 = vpop.f32.mrf.mxu0 }
  0xf0   : > { %v743_v49 = vadd.f32 %v742_v48, %v741_v46  ;;  %v553_v50 = vpop.f32.mrf.mxu1 }
  0xf1   : > { %v744_v51 = vpop.f32.mrf.mxu0 }
  0xf2   : > { %v775_v52 = vpop.f32.mrf.mxu1  ;;  %v551_v54 = vadd.f32 %v743_v49, %v550_v45 }
  0xf3   : > { %v745_v53 = vpop.f32.mrf.mxu0 }
  0xf4   : > { %v746_v55 = vadd.f32 %v745_v53, %v744_v51  ;;  %v564_v57 = vmul.f32 %v551_v54, %v551_v54 }
  0xf6   : > { %v554_v56 = vadd.f32 %v746_v55, %v553_v50 }
  0xf8   : > { %v557_v58 = vadd.f32 %v554_v56, %v551_v54  ;;  %v565_v59 = vmul.f32 %v554_v56, %v554_v56  ;;  %v723_v60 = vpack.c.bf16 %v554_v56, %v551_v54 }
  0xfa   : > { %v558_v61 = vrot.slane %v557_v58, 4  ;;  %v566_v62 = vadd.f32 %v565_v59, %v564_v57  ;;  %724 = vst [vmem:[%s231_s8] sm:$0xff] %v723_v60  }
  0xfc   : > { %v559_v63 = vadd.f32 %v558_v61, %v557_v58  ;;  %v567_v0 = vrot.slane %v566_v62, 4 }
  0xfe   : > { %v560_v1 = vrot.slane %v559_v63, 2  ;;  %v568_v2 = vadd.f32 %v567_v0, %v566_v62 }
 0x100   : > { %v561_v3 = vadd.f32 %v560_v1, %v559_v63  ;;  %v569_v4 = vrot.slane %v568_v2, 2 }
 0x102   : > { %v562_v5 = vrot.slane %v561_v3, 1  ;;  %v570_v6 = vadd.f32 %v569_v4, %v568_v2 }
 0x104   : > { %v571_v7 = vrot.slane %v570_v6, 1  ;;  %v563_v8 = vadd.f32 %v562_v5, %v561_v3 }
 0x106   : > { %v572_v9 = vadd.f32 %v571_v7, %v570_v6 }
 0x108   : > { %v574_v10 = vsel %vm271_vm3, %v563_v8, %v572_v9 }
 0x109   : > { %575 = vst [vmem:[%s235_s11] sm:$0x3] %v574_v10 }
 0x10a PF: > { %s16_s18 = sadd.s32 1, %s816_s18  }
 0x10b   : > { %p13_p4 = scmp.ge.s32.totalorder %s16_s18, 4  }
 0x10d   :  { %15 = sbr.rel (!%p13_p4) target bundleno = 1 (0x1), region = 78 }

// kernel: conv_layer_forward.5
= control target key start
LH: loop header
LB: loop body
LE: loop exit
PB: predicated region body
PF: predicated region fallthrough
CT: control target
= control target key end

     0   :  { %s307_s12 = smov 0   ;;  %s324_s0 = inlined_call_operand.vmem [shape: bf16[2,16,128], index: 0, kind: input, shape index: {}]   ;;  %s325_s1 = inlined_call_operand.vmem [shape: f32[1,128], index: 1, kind: input, shape index: {}]   ;;  %s326_s2 = inlined_call_operand.vmem [shape: f32[1,128], index: 2, kind: input, shape index: {}]   ;;  %s327_s3 = inlined_call_operand.vmem [shape: f32[2,16,128], index: 3, kind: output, shape index: {}]  }
   0x1 LB: > { %s252_s13 = sadd.s32 4294967295, %s285_s12   ;;  %p256_p0 = scmp.ge.s32.totalorder %s285_s12, 1  ;;  %s285_s12 = sphi %s307_s12, %s13_s12  }
   0x2   : > { %p137_p1 = scmp.lt.s32.totalorder %s285_s12, 3 }
   0x4   : > { %p138_p2 = pnand %p256_p0, %p137_p1 }
   0x5   : > { %p161_p3 = scmp.lt.s32.totalorder (!%p138_p2), %s252_s13, 1 }
   0x6   : > { %141 = sbr.rel (%p138_p2) target bundleno = 24 (0x18), region = 32 }
   0xb   : > { %s329_s13 = smov (!%p161_p3, %s252_s13), 1  ;;  %v261_v1 = vld [vmem:[%s325_s1] ss:$0 sm:$0xff] }
   0xc   : > { %s265_s14 = sshll.u32 %s329_s13, 3  ;;  %v262_v4 = vld [vmem:[%s326_s2] ss:$0 sm:$0xff]  ;;  %s266_s22 = sshll.u32 %s329_s13, 4 }
   0xd   : > { %s165_s17 = scalar_lea.vmem %s324_s0, %s265_s14  ;;  %s170_s25 = scalar_lea.vmem %s327_s3, %s266_s22 }
   0xe   : > { %v268_v0 = vld [vmem:[%s165_s17] sm:$0xff]  }
   0xf   : > { %v269_v2 = vunpack.c.l.bf16 %v268_v0  ;;  %v270_v3 = vunpack.c.h.bf16 %v268_v0 }
  0x11   : > { %v182_v5 = vmul.f32 %v269_v2, %v261_v1  ;;  %v183_v6 = vmul.f32 %v270_v3, %v261_v1 }
  0x13   : > { %v191_v7 = vadd.f32 %v262_v4, %v182_v5  ;;  %v192_v8 = vadd.f32 %v262_v4, %v183_v6 }
  0x15   : > { %v193_v9 = vmax.f32 %v191_v7, 0.0  ;;  %v194_v10 = vmax.f32 %v192_v8, 0.0 }
  0x17   : > { %195 = vst [vmem:[%s170_s25] sm:$0xff] %v193_v9  ;;  %196 = vst [vmem:[%s170_s25 + $0x8] sm:$0xff] %v194_v10 }
  0x18 PF: > { %s13_s12 = sadd.s32 1, %s285_s12  }
  0x19   : > { %p10_p4 = scmp.ge.s32.totalorder %s13_s12, 4  }
  0x1b   :  { %12 = sbr.rel (!%p10_p4) target bundleno = 1 (0x1), region = 62 }

</bundles_post_ra>
